<compile_context>
chip_gen: v7x
topology: tpu7x:2x2x1
jax: 0.10.0
libtpu: 0.0.40
codegen_flags: <defaults>
</compile_context>

<pallas_src>
import jax
import jax.numpy as jnp
from jax.experimental import pallas as pl
from jax.experimental.pallas import tpu as pltpu


def _round_up(x, m):
    return ((x + m - 1) // m) * m


# ----------------------------------------------------------------------------
# Fused kernel: de-normalize coefficients (VPU) + one MXU contraction over
# K = n_sp + n_ep + mean_shape add.  Runs once per tile of the flattened 3V
# vertex axis; output is a lane-dense (N, tile) slab -> unmasked vst stream.
# ----------------------------------------------------------------------------
def _bfm_kernel(p_ref, std_ref, cmean_ref, wT_ref, vmean_ref, out_ref):
    # De-normalize the 3DMM coefficients: one vreg of VPU work, recomputing it
    # per tile is free relative to the weight-tile DMA.
    x = p_ref[...] * std_ref[...] + cmean_ref[...]              # (N, K) f32
    x = x.astype(wT_ref.dtype)                                   # bf16 feed when basis is bf16

    # Single fused (N, K) @ (K, tile) contraction, f32 accumulation on the MXU.
    acc = jnp.dot(x, wT_ref[...], preferred_element_type=jnp.float32)

    # mean_shape broadcast over the batch (sublane) axis; lane-dense store.
    out_ref[...] = acc + vmean_ref[...]


# ----------------------------------------------------------------------------
# One-time weight preparation (the nn.Module.__init__ equivalent).
# Concatenate + transpose + lane-pad + (optionally) compress the basis ONCE,
# so the per-call kernel only streams contiguous-ish (K, tile) blocks.
# ----------------------------------------------------------------------------
def prepare_bfm_weights(mean_shape, w_shape, w_exp,
                        xs_mean, xs_std, xe_mean, xe_std,
                        *, tile_3v=4096, weights_dtype=jnp.bfloat16):
    n_sp = w_shape.shape[1]
    n_ep = w_exp.shape[1]
    V3 = w_shape.shape[0]                       # = 3 * num_vertices
    assert w_exp.shape[0] == V3 and mean_shape.size == V3 and V3 % 3 == 0

    # Lane-aligned tile, clamped for small models; pad 3V to a tile multiple so
    # real BFM sizes (3V = 101232, not a 128-multiple) run with dense tiles.
    tile_3v = min(tile_3v, _round_up(V3, 128))
    assert tile_3v % 128 == 0
    V3_pad = _round_up(V3, tile_3v)
    pad = V3_pad - V3

    # Fused basis [w_shape | w_exp] with the 3V axis on lanes, zero-padded.
    w_cat = jnp.concatenate([w_shape, w_exp], axis=1)            # (3V, K) f32
    wT = jnp.pad(w_cat.T, ((0, 0), (0, pad))).astype(weights_dtype)   # (K, V3_pad)

    mean_flat = jnp.pad(mean_shape.reshape(1, V3),
                        ((0, 0), (0, pad))).astype(jnp.float32)  # (1, V3_pad)
    x_std = jnp.concatenate([xs_std.reshape(1, n_sp),
                             xe_std.reshape(1, n_ep)], axis=1).astype(jnp.float32)
    x_mean = jnp.concatenate([xs_mean.reshape(1, n_sp),
                              xe_mean.reshape(1, n_ep)], axis=1).astype(jnp.float32)

    return dict(wT=wT, mean_flat=mean_flat, x_std=x_std, x_mean=x_mean,
                n_sp=n_sp, n_ep=n_ep, V3=V3, V3_pad=V3_pad, tile_3v=tile_3v)


# ----------------------------------------------------------------------------
# Wrapper: the nn.Module.forward equivalent.
# ----------------------------------------------------------------------------
def bfm_forward(params, prepared, *, batch=True, weight_buffers=2):
    """params: (N, >= n_sp+n_ep) f32 (or (n_sp+n_ep,) when batch=False).
    Returns (N, V, 3) float32 (or (V, 3) when batch=False)."""
    if not batch:
        params = params[None, :]

    n_sp, n_ep = prepared["n_sp"], prepared["n_ep"]
    K = n_sp + n_ep
    V3, V3_pad, tile = prepared["V3"], prepared["V3_pad"], prepared["tile_3v"]
    wT, mean_flat = prepared["wT"], prepared["mean_flat"]
    x_std, x_mean = prepared["x_std"], prepared["x_mean"]

    N = params.shape[0]
    # Mirrors the torch slicing: params[:, :n_sp] then params[:, n_sp:n_sp+n_ep]
    # (matches the [w_shape | w_exp] concat order of the fused basis).
    p = params[:, :K].astype(jnp.float32)                        # (N, K)

    grid = (V3_pad // tile,)

    # Optional deeper buffering on the weight stream (sweep 2 vs 3 on v6e).
    w_spec_kwargs = {}
    if weight_buffers != 2:
        w_spec_kwargs["pipeline_mode"] = pl.Buffered(weight_buffers)

    itemsize = jnp.dtype(wT.dtype).itemsize
    cost = pl.CostEstimate(
        flops=2 * N * K * V3_pad,
        transcendentals=0,
        bytes_accessed=(wT.size * itemsize          # basis stream (dominant)
                        + mean_flat.size * 4
                        + N * V3_pad * 4            # output
                        + N * K * 4 + 2 * K * 4),   # coeffs + stats
    )

    out_flat = pl.pallas_call(
        _bfm_kernel,
        out_shape=jax.ShapeDtypeStruct((N, V3_pad), jnp.float32),
        grid_spec=pltpu.PrefetchScalarGridSpec(
            num_scalar_prefetch=0,
            grid=grid,
            in_specs=[
                pl.BlockSpec((N, K), lambda j: (0, 0)),                 # raw coeffs
                pl.BlockSpec((1, K), lambda j: (0, 0)),                 # coeff std
                pl.BlockSpec((1, K), lambda j: (0, 0)),                 # coeff mean
                pl.BlockSpec((K, tile), lambda j: (0, j),
                             **w_spec_kwargs),                          # fused basis tile
                pl.BlockSpec((1, tile), lambda j: (0, j)),              # mean_shape tile
            ],
            out_specs=pl.BlockSpec((N, tile), lambda j: (0, j)),
        ),
        compiler_params=pltpu.CompilerParams(
            # Output tiles along 3V are independent -> megacore/2-TC friendly.
            dimension_semantics=("parallel",),
        ),
        cost_estimate=cost,
    )(p, x_std, x_mean, wT, mean_flat)

    mesh_pre = out_flat[:, :V3].reshape(N, V3 // 3, 3)
    if not batch:
        mesh_pre = mesh_pre[0]                    # torch .squeeze() with N == 1
    return mesh_pre


# ----------------------------------------------------------------------------
# Pure-JAX references mirroring the torch forward.
# ----------------------------------------------------------------------------
def _ref_forward(params, xs_mean, xs_std, xe_mean, xe_std,
                 mean_shape, w_shape, w_exp):
    N = params.shape[0]
    n_sp = w_shape.shape[1]
    n_ep = w_exp.shape[1]
    xs = params[:, :n_sp] * xs_std + xs_mean
    xe = params[:, n_sp:n_sp + n_ep] * xe_std + xe_mean
    hi = jax.lax.Precision.HIGHEST
    ds = jnp.matmul(w_shape, xs[:, :, None], precision=hi).reshape(N, -1, 3)
    de = jnp.matmul(w_exp, xe[:, :, None], precision=hi).reshape(N, -1, 3)
    return mean_shape[None] + ds + de


def _ref_forward_bf16_basis(params, xs_mean, xs_std, xe_mean, xe_std,
                            mean_shape, w_shape, w_exp):
    # Reference for the bf16-compressed basis path: same operand rounding as
    # the kernel (bf16 basis, bf16 coefficient feed), f32 accumulation.
    N = params.shape[0]
    n_sp = w_shape.shape[1]
    n_ep = w_exp.shape[1]
    xs = (params[:, :n_sp] * xs_std + xs_mean).astype(jnp.bfloat16).astype(jnp.float32)
    xe = (params[:, n_sp:n_sp + n_ep] * xe_std + xe_mean).astype(jnp.bfloat16).astype(jnp.float32)
    ws = w_shape.astype(jnp.bfloat16).astype(jnp.float32)
    we = w_exp.astype(jnp.bfloat16).astype(jnp.float32)
    hi = jax.lax.Precision.HIGHEST
    ds = jnp.matmul(ws, xs[:, :, None], precision=hi).reshape(N, -1, 3)
    de = jnp.matmul(we, xe[:, :, None], precision=hi).reshape(N, -1, 3)
    return mean_shape[None] + ds + de


if __name__ == "__main__":
    key = jax.random.PRNGKey(0)
    ks = jax.random.split(key, 8)

    # Small shapes consistent with the module (real BFM: n_sp~199, n_ep~29,
    # 3V ~ 101232; same kernel, just more / larger 3V tiles).
    N = 4           # batch
    n_sp = 32       # shape coefficients
    n_ep = 16       # expression coefficients
    V = 256         # vertices -> 3V = 768
    V3 = 3 * V

    w_shape = jax.random.normal(ks[0], (V3, n_sp), jnp.float32) * 0.1
    w_exp = jax.random.normal(ks[1], (V3, n_ep), jnp.float32) * 0.1
    mean_shape = jax.random.normal(ks[2], (V, 3), jnp.float32)

    xs_mean = jax.random.normal(ks[3], (1, n_sp), jnp.float32) * 0.1
    xs_std = jax.random.uniform(ks[4], (1, n_sp), jnp.float32, minval=0.5, maxval=1.5)
    xe_mean = jax.random.normal(ks[5], (1, n_ep), jnp.float32) * 0.1
    xe_std = jax.random.uniform(ks[6], (1, n_ep), jnp.float32, minval=0.5, maxval=1.5)

    params = jax.random.normal(ks[7], (N, n_sp + n_ep), jnp.float32)

    ref = _ref_forward(params, xs_mean, xs_std, xe_mean, xe_std,
                       mean_shape, w_shape, w_exp)

    # --- f32-basis mode: tight parity with the float32 torch forward ---------
    prep_f32 = prepare_bfm_weights(mean_shape, w_shape, w_exp,
                                   xs_mean, xs_std, xe_mean, xe_std,
                                   tile_3v=4096, weights_dtype=jnp.float32)
    mesh_f32 = bfm_forward(params, prep_f32)
    jax.block_until_ready(mesh_f32)
    assert mesh_f32.shape == (N, V, 3)
    assert bool(jnp.allclose(mesh_f32, ref, rtol=5e-3, atol=5e-3)), "f32 mismatch vs reference"

    # --- default perf mode: bf16-compressed basis (HBM-bandwidth bound) ------
    prep_bf16 = prepare_bfm_weights(mean_shape, w_shape, w_exp,
                                    xs_mean, xs_std, xe_mean, xe_std,
                                    tile_3v=4096, weights_dtype=jnp.bfloat16)
    mesh_bf16 = bfm_forward(params, prep_bf16)
    jax.block_until_ready(mesh_bf16)
    ref_bf16 = _ref_forward_bf16_basis(params, xs_mean, xs_std, xe_mean, xe_std,
                                       mean_shape, w_shape, w_exp)
    assert mesh_bf16.shape == (N, V, 3)
    assert bool(jnp.allclose(mesh_bf16, ref_bf16, rtol=2e-3, atol=2e-3)), "bf16 mismatch"

    # --- batch=False path (torch: unsqueeze -> squeeze) ----------------------
    mesh1 = bfm_forward(params[0], prep_f32, batch=False)
    jax.block_until_ready(mesh1)
    assert mesh1.shape == (V, 3)
    assert bool(jnp.allclose(mesh1, ref[0], rtol=5e-3, atol=5e-3))

    # TODO(synk): param2mesh (no coefficient de-norm) and the `faces` index
    # buffer are not part of forward(); not implemented here.

    print("KERNEL_OK")
</pallas_src>

<mosaic_0001>
module attributes {stable_mosaic.version = 11 : i64} {
  func.func @_bfm_kernel(%arg0: i32, %arg1: memref<4x48xf32, #tpu.memory_space<vmem>>, %arg2: memref<1x48xf32, #tpu.memory_space<vmem>>, %arg3: memref<1x48xf32, #tpu.memory_space<vmem>>, %arg4: memref<48x768xf32, #tpu.memory_space<vmem>>, %arg5: memref<1x768xf32, #tpu.memory_space<vmem>>, %arg6: memref<4x768xf32, #tpu.memory_space<vmem>>) attributes {dimension_semantics = [#tpu.dimension_semantics<parallel>], iteration_bounds = array<i64: 1>, scalar_prefetch = 0 : i64, scratch_operands = 0 : i64, tpu.core_type = #tpu.core_type<tc>, window_params = [{pipeline_mode = #tpu.pipeline_mode<synchronous>, transform_indices = @transform_0, window_bounds = array<i64: 4, 48>}, {pipeline_mode = #tpu.pipeline_mode<synchronous>, transform_indices = @transform_1, window_bounds = array<i64: 1, 48>}, {pipeline_mode = #tpu.pipeline_mode<synchronous>, transform_indices = @transform_2, window_bounds = array<i64: 1, 48>}, {transform_indices = @transform_3, window_bounds = array<i64: 48, 768>}, {transform_indices = @transform_4, window_bounds = array<i64: 1, 768>}, {transform_indices = @transform_5, window_bounds = array<i64: 4, 768>}]} {
    %c0 = arith.constant 0 : index
    %c0_0 = arith.constant 0 : index
    %0 = vector.load %arg1[%c0, %c0_0] : memref<4x48xf32, #tpu.memory_space<vmem>>, vector<4x48xf32>
    %c0_1 = arith.constant 0 : index
    %c0_2 = arith.constant 0 : index
    %1 = vector.load %arg2[%c0_1, %c0_2] : memref<1x48xf32, #tpu.memory_space<vmem>>, vector<1x48xf32>
    %2 = vector.broadcast %1 : vector<1x48xf32> to vector<4x48xf32>
    %3 = arith.mulf %0, %2 : vector<4x48xf32>
    %c0_3 = arith.constant 0 : index
    %c0_4 = arith.constant 0 : index
    %4 = vector.load %arg3[%c0_3, %c0_4] : memref<1x48xf32, #tpu.memory_space<vmem>>, vector<1x48xf32>
    %5 = vector.broadcast %4 : vector<1x48xf32> to vector<4x48xf32>
    %6 = arith.addf %3, %5 : vector<4x48xf32>
    %c0_5 = arith.constant 0 : index
    %c0_6 = arith.constant 0 : index
    %7 = vector.load %arg4[%c0_5, %c0_6] : memref<48x768xf32, #tpu.memory_space<vmem>>, vector<48x768xf32>
    %cst = arith.constant dense<0.000000e+00> : vector<4x768xf32>
    %8 = tpu.matmul %6, %7, %cst {dimension_numbers = #tpu.dot_dimension_numbers<[1], [0], [0], [1], [0, 0, 1, 1], [], []>} : vector<4x48xf32>, vector<48x768xf32>, vector<4x768xf32> -> vector<4x768xf32>
    %c0_7 = arith.constant 0 : index
    %c0_8 = arith.constant 0 : index
    %9 = vector.load %arg5[%c0_7, %c0_8] : memref<1x768xf32, #tpu.memory_space<vmem>>, vector<1x768xf32>
    %10 = vector.broadcast %9 : vector<1x768xf32> to vector<4x768xf32>
    %11 = arith.addf %8, %10 : vector<4x768xf32>
    %c0_9 = arith.constant 0 : index
    %c0_10 = arith.constant 0 : index
    %12 = vector.load %arg6[%c0_9, %c0_10] : memref<4x768xf32, #tpu.memory_space<vmem>>, vector<4x768xf32>
    tpu.vector_store %arg6[%c0_9, %c0_10], %11 {strides = array<i32>} : memref<4x768xf32, #tpu.memory_space<vmem>>, vector<4x768xf32>,
    return
  }
  func.func @transform_0(%arg0: i32) -> (i32, i32) {
    %c0_i32 = arith.constant 0 : i32
    %c0_i32_0 = arith.constant 0 : i32
    %c0_i32_1 = arith.constant 0 : i32
    return %c0_i32, %c0_i32_0 : i32, i32
  }
  func.func @transform_1(%arg0: i32) -> (i32, i32) {
    %c0_i32 = arith.constant 0 : i32
    %c0_i32_0 = arith.constant 0 : i32
    %c0_i32_1 = arith.constant 0 : i32
    return %c0_i32, %c0_i32_0 : i32, i32
  }
  func.func @transform_2(%arg0: i32) -> (i32, i32) {
    %c0_i32 = arith.constant 0 : i32
    %c0_i32_0 = arith.constant 0 : i32
    %c0_i32_1 = arith.constant 0 : i32
    return %c0_i32, %c0_i32_0 : i32, i32
  }
  func.func @transform_3(%arg0: i32) -> (i32, i32) {
    %c0_i32 = arith.constant 0 : i32
    %c0_i32_0 = arith.constant 0 : i32
    return %c0_i32, %arg0 : i32, i32
  }
  func.func @transform_4(%arg0: i32) -> (i32, i32) {
    %c0_i32 = arith.constant 0 : i32
    %c0_i32_0 = arith.constant 0 : i32
    return %c0_i32, %arg0 : i32, i32
  }
  func.func @transform_5(%arg0: i32) -> (i32, i32) {
    %c0_i32 = arith.constant 0 : i32
    %c0_i32_0 = arith.constant 0 : i32
    return %c0_i32, %arg0 : i32, i32
  }
}

</mosaic_0001>

<bundles_post_ra>
// kernel: tpu_custom_call.1
= control target key start
LH: loop header
LB: loop body
LE: loop exit
PB: predicated region body
PF: predicated region fallthrough
CT: control target
= control target key end

     0   :  { %10 = vsyncpa [#allocation3], 0  ;;  %s593_s0 = inlined_call_operand.hbm [shape: f32[4,48], index: 0, kind: input, shape index: {}]   ;;  %s594_s1 = inlined_call_operand.vmem [shape: f32[1,48], index: 1, kind: input, shape index: {}]   ;;  %s595_s2 = inlined_call_operand.vmem [shape: f32[1,48], index: 2, kind: input, shape index: {}]   ;;  %s596_s3 = inlined_call_operand.hbm [shape: f32[48,768], index: 3, kind: input, shape index: {}]   ;;  %s597_s4 = inlined_call_operand.vmem [shape: f32[1,768], index: 4, kind: input, shape index: {}]   ;;  %s598_s5 = inlined_call_operand.hbm [shape: f32[4,768], index: 5, kind: output, shape index: {}]  }
   0x1   :  { %11 = vsyncpa [#allocation6], 0 }
   0x2   :  { %12 = vsyncpa [#allocation4], 0  ;;  %s499_s18 = smov [#allocation2]   ;;  %s500_s20 = smov [#allocation5]  }
   0x3   :  { %s19_s19 = sshll.u32 %s499_s18, 4  ;;  %s32_s21 = sshll.u32 %s500_s20, 4  ;;  %s20_s19 = int_to_ptr.vmem [resolvable:$true] %s19_s19  ;;  %s535_s21 = int_to_ptr.vmem [resolvable:$true] %s32_s21 }
   0x4   :  { %s427_s24 = scalar_lea.hbm %s593_s0, 64 }
   0x5   :  { %p428_p0 = scmp.ne.s32.totalorder %s593_s0, %s427_s24  ;;  %p431_p1 = scmp.lt.u32.totalorder %s427_s24, %s593_s0 }
   0x7   :  { %p433_p2 = pnand %p431_p1, %p428_p0 }
   0x9   :  { %436 = shalt.err (!%p433_p2)
}
   0xa   :  { %s437_s29 = scalar_lea.vmem %s20_s19, 64  ;;  %p442_p4 = scmp.lt.s32.totalorder %s20_s19, %s20_s19 }
   0xb   :  { %p438_p3 = scmp.ne.s32.totalorder %s20_s19, %s437_s29  ;;  %p443_p5 = scmp.lt.s32.totalorder %s437_s29, %s437_s29 }
   0xd   :  { %p444_p6 = por %p443_p5, %p442_p4 }
   0xf   :  { %p445_p7 = pnand %p444_p6, %p438_p3 }
  0x11   :  { %448 = shalt.err (!%p445_p7)
}
  0x12   :  { %22 = dma.hbm_to_vmem [thread:$0]  %s593_s0, 64, %s20_s19, [#allocation3]  }
  0x13   :  { %s449_s9 = scalar_lea.hbm %s596_s3, 4608 }
  0x14   :  { %p450_p8 = scmp.ne.s32.totalorder %s596_s3, %s449_s9  ;;  %p453_p9 = scmp.lt.u32.totalorder %s449_s9, %s596_s3 }
  0x16   :  { %p455_p10 = pnand %p453_p9, %p450_p8 }
  0x18   :  { %458 = shalt.err (!%p455_p10)
}
  0x19   :  { %s459_s14 = scalar_lea.vmem %s535_s21, 4608  ;;  %p464_p12 = scmp.lt.s32.totalorder %s535_s21, %s535_s21 }
  0x1a   :  { %p460_p11 = scmp.ne.s32.totalorder %s535_s21, %s459_s14  ;;  %p465_p13 = scmp.lt.s32.totalorder %s459_s14, %s459_s14 }
  0x1c   :  { %p466_p0 = por %p465_p13, %p464_p12 }
  0x1e   :  { %p467_p1 = pnand %p466_p0, %p460_p11 }
  0x20   :  { %470 = shalt.err (!%p467_p1)
}
  0x21   :  { %s501_s0 = smov 768   ;;  %s502_s15 = smov 48  }
  0x22   :  { %38 = dma.hbm_to_vmem [thread:$0]  %s596_s3, 4608, %s535_s21, [#allocation6], %s501_s0, %s501_s0, %s502_s15  }
  0x23   :  { %493 = dma.done.wait [#allocation3], 64  }
  0x24   :  { %494 = vsyncadd [#allocation3], 4294967232 }
  0x25   :  { %495 = dma.done.wait [#allocation6], 4608  }
  0x26   :  { %496 = vsyncadd [#allocation6], 4294962688  ;;  %v503_v0 = vmov 0.0   ;;  %v65_v1 = vld [vmem:[#allocation5 + $0x8] sm:$0xff]  ;;  %v71_v2 = vld [vmem:[#allocation5 + $0x38] sm:$0xff]  ;;  %vm132_vm0 = vcmask 392192   ;;  %v102_v60 = vlaneseq }
  0x27   :  { %200 = vmatprep.mubr.f32.mxu0 %v503_v0  ;;  %271 = vmatprep.mubr.f32.mxu1 %v503_v0  ;;  %v64_v3 = vld [vmem:[#allocation5] sm:$0xff]  ;;  %v385_v4 = vpack.c.bf16 %v71_v2, %v65_v1  ;;  %v70_v5 = vld [vmem:[#allocation5 + $0x30] sm:$0xff]  ;;  %v77_v6 = vld [vmem:[#allocation5 + $0x68] sm:$0xff] }
  0x28   :  { %v83_v7 = vld [vmem:[#allocation5 + $0x98] sm:$0xff]  ;;  %v387_v8 = vpack.c.bf16 %v70_v5, %v64_v3  ;;  %v76_v10 = vld [vmem:[#allocation5 + $0x60] sm:$0xff]  ;;  %v82_v11 = vld [vmem:[#allocation5 + $0x90] sm:$0xff]  ;;  %v103_v61 = vshrl.u32 %v102_v60, 7 }
  0x29   :  { %v389_v9 = vpack.c.bf16 %v83_v7, %v77_v6  ;;  %v89_v12 = vld [vmem:[#allocation5 + $0xc8] sm:$0xff]  ;;  %386 = vmatprep.subr.bf16.mxu0 %v385_v4  ;;  %v95_v13 = vld [vmem:[#allocation5 + $0xf8] sm:$0xff]  ;;  %v88_v14 = vld [vmem:[#allocation5 + $0xc0] sm:$0xff]  ;;  %v391_v15 = vpack.c.bf16 %v82_v11, %v76_v10 }
  0x2a   :  { %388 = vmatpush1.bf16.msra.mxu0 %v387_v8  ;;  %v67_v16 = vld [vmem:[#allocation5 + $0x18] sm:$0xff]  ;;  %v73_v17 = vld [vmem:[#allocation5 + $0x48] sm:$0xff]  ;;  %v393_v19 = vpack.c.bf16 %v95_v13, %v89_v12  ;;  %v94_v20 = vld [vmem:[#allocation5 + $0xf0] sm:$0xff]  ;;  %v104_v62 = vsub.s32 0, %v103_v61  ;;  %v112_v3 = vsub.s32 2, %v103_v61  ;;  %v116_v4 = vsub.s32 3, %v103_v61 }
  0x2b   :  { %v47_v18 = vld [vmem:[#allocation2] sm:$0xf]  ;;  %390 = vmatprep.subr.bf16.mxu0 %v389_v9  ;;  %v397_v21 = vpack.c.bf16 %v73_v17, %v67_v16  ;;  %v380_v22 = vld [vmem:[%s594_s1] ss:$0 sm:$0xff]  ;;  %v72_v24 = vld [vmem:[#allocation5 + $0x40] sm:$0xff]  ;;  %v395_v31 = vpack.c.bf16 %v94_v20, %v88_v14  ;;  %v120_v13 = vsub.s32 4, %v103_v61 }
  0x2c   :  { %v66_v23 = vld [vmem:[#allocation5 + $0x10] sm:$0xff]  ;;  %v69_v25 = vld [vmem:[#allocation5 + $0x28] sm:$0xff]  ;;  %v75_v26 = vld [vmem:[#allocation5 + $0x58] sm:$0xff]  ;;  %v55_v27 = vmul.f32 %v380_v22, %v47_v18  ;;  %v124_v16 = vsub.s32 5, %v103_v61 }
  0x2d   :  { %398 = vmatprep.subr.bf16.mxu1 %v397_v21  ;;  %v381_v28 = vld [vmem:[%s595_s2] ss:$0 sm:$0xff]  ;;  %v399_v29 = vpack.c.bf16 %v72_v24, %v66_v23  ;;  %v79_v30 = vld [vmem:[#allocation5 + $0x78] sm:$0xff]  ;;  %v85_v32 = vld [vmem:[#allocation5 + $0xa8] sm:$0xff]  ;;  %v409_v35 = vpack.c.bf16 %v75_v26, %v69_v25 }
  0x2e   :  { %392 = vmatpush1.bf16.msra.mxu0 %v391_v15  ;;  %v78_v33 = vld [vmem:[#allocation5 + $0x70] sm:$0xff]  ;;  %v84_v34 = vld [vmem:[#allocation5 + $0xa0] sm:$0xff]  ;;  %v401_v38 = vpack.c.bf16 %v85_v32, %v79_v30  ;;  %v81_v40 = vld [vmem:[#allocation5 + $0x88] sm:$0xff]  ;;  %v63_v44 = vadd.f32 %v381_v28, %v55_v27 }
  0x2f   :  { %394 = vmatprep.subr.bf16.mxu0 %v393_v19  ;;  %400 = vmatpush1.bf16.msra.mxu1 %v399_v29  ;;  %v68_v36 = vld [vmem:[#allocation5 + $0x20] sm:$0xff]  ;;  %v74_v37 = vld [vmem:[#allocation5 + $0x50] sm:$0xff]  ;;  %v403_v39 = vpack.c.bf16 %v84_v34, %v78_v33  ;;  %v87_v41 = vld [vmem:[#allocation5 + $0xb8] sm:$0xff] }
  0x30   :  { %v91_v42 = vld [vmem:[#allocation5 + $0xd8] sm:$0xff]  ;;  %v97_v43 = vld [vmem:[#allocation5 + $0x108] sm:$0xff]  ;;  %402 = vmatprep.subr.bf16.mxu1 %v401_v38  ;;  %v90_v46 = vld [vmem:[#allocation5 + $0xd0] sm:$0xff]  ;;  %v411_v48 = vpack.c.bf16 %v74_v37, %v68_v36  ;;  %v413_v49 = vpack.c.bf16 %v87_v41, %v81_v40 }
  0x31   :  { %v405_v45 = vpack.c.bf16 %v97_v43, %v91_v42  ;;  %v96_v47 = vld [vmem:[#allocation5 + $0x100] sm:$0xff]  ;;  %v86_v51 = vld [vmem:[#allocation5 + $0xb0] sm:$0xff]  ;;  %v93_v53 = vld [vmem:[#allocation5 + $0xe8] sm:$0xff] }
  0x32   :  { %396 = vmatpush1.bf16.msra.mxu0 %v395_v31  ;;  %v80_v50 = vld [vmem:[#allocation5 + $0x80] sm:$0xff]  ;;  %v407_v52 = vpack.c.bf16 %v96_v47, %v90_v46  ;;  %v99_v54 = vld [vmem:[#allocation5 + $0x118] sm:$0xff]  ;;  %v98_v58 = vld [vmem:[#allocation5 + $0x110] sm:$0xff] }
  0x33   :  { %410 = vmatprep.subr.bf16.mxu0 %v409_v35  ;;  %404 = vmatpush1.bf16.msra.mxu1 %v403_v39  ;;  %v415_v55 = vpack.c.bf16 %v86_v51, %v80_v50  ;;  %v417_v56 = vpack.c.bf16 %v99_v54, %v93_v53  ;;  %v92_v57 = vld [vmem:[#allocation5 + $0xe0] sm:$0xff]  ;;  %v100_v63 = vld [vmem:[%s597_s4] sm:$0x3f]  ;;  %s504_s4 = smov [#allocation7]  }
  0x34   :  { %406 = vmatprep.subr.bf16.mxu1 %v405_v45  ;;  %v419_v59 = vpack.c.bf16 %v98_v58, %v92_v57  ;;  %v105_v1 = vrot.slane %v100_v63, %v104_v62  ;;  %v113_v9 = vrot.slane %v100_v63, %v112_v3  ;;  %v117_v10 = vrot.slane %v100_v63, %v116_v4  ;;  %s370_s21 = sshll.u32 %s504_s4, 4  ;;  %s371_s21 = int_to_ptr.vmem [resolvable:$true] %s370_s21 }
  0x35   :  { %382 = vmatmul.mubr.msk.f32.vlgmr.msra.gmra.mrb[0].mxu0 %vm132_vm0, %v63_v44  ;;  %v121_v19 = vrot.slane %v100_v63, %v120_v13  ;;  %v125_v20 = vrot.slane %v100_v63, %v124_v16  ;;  %s471_s22 = scalar_lea.vmem %s371_s21, 384  ;;  %p476_p3 = scmp.lt.s32.totalorder %s371_s21, %s371_s21 }
  0x36   :  { %412 = vmatpush1.bf16.msra.mxu0 %v411_v48  ;;  %342 = vmatprep.mubr.f32.mxu0 %v503_v0  ;;  %v108_v0 = vsub.s32 1, %v103_v61  ;;  %p472_p2 = scmp.ne.s32.totalorder %s371_s21, %s471_s22  ;;  %p477_p4 = scmp.lt.s32.totalorder %s471_s22, %s471_s22 }
  0x37   :  { %414 = vmatprep.subr.bf16.mxu0 %v413_v49  ;;  %408 = vmatpush1.bf16.msra.mxu1 %v407_v52 }
  0x38   :  { %v109_v2 = vrot.slane %v100_v63, %v108_v0  ;;  %p478_p5 = por %p477_p4, %p476_p3 }
  0x3a   :  { %416 = vmatpush1.bf16.msra.mxu0 %v415_v55  ;;  %383 = vmatmul.mubr.msk.f32.vlgmr.msra.gmra.mrb[0].mxu1 %vm132_vm0, %v63_v44  ;;  %p479_p6 = pnand %p478_p5, %p472_p2 }
  0x3b   :  { %418 = vmatprep.subr.bf16.mxu0 %v417_v56 }
  0x3e   :  { %420 = vmatpush1.bf16.msra.mxu0 %v419_v59 }
  0x41   :  { %384 = vmatmul.mubr.msk.f32.vlgmr.msra.gmra.mrb[2].mxu0 %vm132_vm0, %v63_v44 }
 0x108   :  { %v202_v5 = vpop.f32.mrb[0].mxu0 }
 0x109   :  { %v203_v6 = vadd.f32 %v202_v5, %v105_v1  ;;  %v204_v7 = vpop.f32.mrb[1].mxu0 }
 0x10a   :  { %v205_v8 = vadd.f32 %v204_v7, %v109_v2 }
 0x10c   :  { %v355_v11 = vcombine.low %v203_v6, %v205_v8 }
 0x10d   :  { %v273_v12 = vpop.f32.mrb[0].mxu1 }
 0x10e   :  { %361 = vst [vmem:[#allocation7] sm:$0xff] %v355_v11  ;;  %v274_v14 = vadd.f32 %v273_v12, %v113_v9  ;;  %v275_v15 = vpop.f32.mrb[1].mxu1 }
 0x10f   :  { %v276_v17 = vadd.f32 %v275_v15, %v117_v10 }
 0x111   :  { %v356_v18 = vcombine.low %v274_v14, %v276_v17 }
 0x113   :  { %362 = vst [vmem:[#allocation7 + $0x8] sm:$0xff] %v356_v18 }
 0x114   :  { %v344_v21 = vpop.f32.mrb[2].mxu0 }
 0x115   :  { %v345_v22 = vadd.f32 %v344_v21, %v121_v19  ;;  %v346_v23 = vpop.f32.mrb[3].mxu0 }
 0x116   :  { %v347_v24 = vadd.f32 %v346_v23, %v125_v20 }
 0x118   :  { %v357_v25 = vcombine.low %v345_v22, %v347_v24 }
 0x11a   :  { %363 = vst [vmem:[#allocation7 + $0x10] sm:$0xff] %v357_v25 }
 0x11b   :  { %482 = shalt.err (!%p479_p6)
}
 0x11c   :  { %s483_s25 = scalar_lea.hbm %s598_s5, 384 }
 0x11d   :  { %p484_p7 = scmp.ne.s32.totalorder %s598_s5, %s483_s25  ;;  %p487_p8 = scmp.lt.u32.totalorder %s483_s25, %s598_s5 }
 0x11f   :  { %p489_p9 = pnand %p487_p8, %p484_p7 }
 0x121   :  { %492 = shalt.err (!%p489_p9)
}
 0x122   :  { %373 = dma.vmem_to_hbm [thread:$0]  %s371_s21, 384, %s598_s5, [#allocation4]  }
 0x123   :  { %497 = dma.done.wait [#allocation4], 384  }
 0x124   :  { %498 = vsyncadd [#allocation4], 4294966912 }
 0x125   :  { %377 = vsyncpa [#allocation3], 1 }
 0x126   :  { %378 = vsyncpa [#allocation6], 1 }
 0x127   :  { %379 = vsyncpa [#allocation4], 1 }

</bundles_post_ra>
